<compile_context>
chip_gen: v6e
topology: v6e:2x2x1
jax: 0.10.0
libtpu: 0.0.40
codegen_flags: <defaults>
</compile_context>

<pallas_src>
import numpy as np
import jax
import jax.numpy as jnp
from jax import lax
from jax.experimental import pallas as pl
from jax.experimental.pallas import tpu as pltpu


# ------------------------------ host-side precompute --------------------------

def _conv_in_weight_matrix(w_torch):
    """torch Conv1d weight (C_out, C_in, K) -> im2col matmul weight (C_out, K*C_in).

    Column index is k*C_in + ci, matching the in-kernel im2col row ordering.
    """
    C_out, C_in, K = w_torch.shape
    return jnp.transpose(w_torch, (0, 2, 1)).reshape(C_out, K * C_in)


def _stage_selectors(L, s):
    """0/1 selection matrices S_k with shape (2s+1, L, L*s) such that
    Stretch2d(s,1,'nearest') followed by Conv2d(1,1,(1,2s+1),padding=(0,s),bias=False)
    applied to a length-L signal y equals   y @ (sum_k w[k] * S_k)."""
    Kt = 2 * s + 1
    T_out = L * s
    sel = np.zeros((Kt, L, T_out), np.float32)
    for t in range(T_out):
        for k in range(Kt):
            j = t + k - s                  # index into the (unpadded) stretched signal
            if 0 <= j < T_out:
                sel[k, j // s, t] = 1.0    # stretched[j] == y[j // s]
    return sel


def _build_upsample_matrix(T_mid, upsample_scales, up_weights):
    """Compose all upsample stages into one dense (T_mid, T_mid*prod(scales)) matrix.

    TODO(synk): at production sequence lengths replace this O(T^2) dense precompute
    with a banded construction (every column has only a handful of nonzero rows).
    """
    U = jnp.eye(T_mid, dtype=jnp.float32)
    L = T_mid
    for s, w in zip(upsample_scales, up_weights):
        s = int(s)
        sel = jnp.asarray(_stage_selectors(L, s))                 # (2s+1, L, L*s)
        M = jnp.einsum("k,klt->lt", w.astype(jnp.float32), sel)   # (L, L*s)
        U = U @ M
        L = L * s
    return U


def _pick_time_tile(T_pad, target=512):
    """Largest multiple of 128 that divides T_pad and is <= target (T_pad if small)."""
    if T_pad <= target:
        return T_pad
    best = 128                       # T_pad is a multiple of 128, so 128 always divides
    t = 256
    while t <= target:
        if T_pad % t == 0:
            best = t
        t += 128
    return best


# ------------------------------ fused Pallas kernel ---------------------------

def _fused_kernel(x_ref, w_ref, u_ref, o_ref):
    """conv_in (batched im2col matmul) + one output-time tile of the upsample matmul.

    x_ref: (B, C, T)       full batch of aux features (grid-invariant), f32
    w_ref: (C, K*C)        im2col conv_in weight, bf16 (grid-invariant)
    u_ref: (T_mid, TT)     column block of the composed upsample matrix, bf16
    o_ref: (B*C, TT)       lane-dense, (8,128)-aligned output block, f32
    """
    x = x_ref[...]                                   # (B, C, T)
    B, C, T = x.shape
    K = w_ref.shape[1] // C
    T_mid = u_ref.shape[0]                           # == T - K + 1

    # conv_in: per-sample im2col (K static lane slices stacked on the sublane axis)
    # followed by one 160-deep MXU dot; rows of all samples are stacked so the big
    # upsample dot below runs with M = B*C rows instead of C.
    rows = []
    for b in range(B):                               # static unroll, B is small
        x_im = jnp.concatenate([x[b, :, k:k + T_mid] for k in range(K)],
                               axis=0)               # (K*C, T_mid)
        rows.append(jnp.dot(w_ref[...], x_im.astype(jnp.bfloat16),
                            preferred_element_type=jnp.float32))        # (C, T_mid)
    y = jnp.concatenate(rows, axis=0)                # (B*C, T_mid), f32 accumulation

    # All Stretch2d + Conv2d upsample stages folded into one dense matmul against the
    # current output-time column block of U.  bf16 operands, f32 accumulate.
    out = jnp.dot(y.astype(jnp.bfloat16), u_ref[...],
                  preferred_element_type=jnp.float32)                   # (B*C, TT)
    o_ref[...] = out.astype(o_ref.dtype)


# ------------------------------- full forward ---------------------------------

def conv_in_upsample_forward(c, params, upsample_scales, *, time_tile_target=512):
    """ConvInUpsampleNetwork.forward (use_causal_conv=False, no nonlinearity)."""
    B, C, T = c.shape
    w_torch = params["conv_in_w"]                    # (C_out, C_in, K)
    K = int(w_torch.shape[-1])
    T_mid = T - K + 1
    T_final = T_mid * int(np.prod(upsample_scales))
    T_pad = ((T_final + 127) // 128) * 128           # lane-dense padded output width
    TT = _pick_time_tile(T_pad, time_tile_target)    # output time tile (multiple of 128)
    n_tiles = T_pad // TT

    # bf16 MXU operands; accumulation stays f32 inside the kernel.
    w_flat = _conv_in_weight_matrix(w_torch).astype(jnp.bfloat16)            # (C, K*C)
    U = _build_upsample_matrix(T_mid, upsample_scales, params["up_w"])       # (T_mid, T_final)
    U_pad = jnp.pad(U, ((0, 0), (0, T_pad - T_final))).astype(jnp.bfloat16)  # (T_mid, T_pad)

    cost = pl.CostEstimate(
        flops=2 * B * C * (K * C) * T_mid + 2 * (B * C) * T_mid * T_pad,
        transcendentals=0,
        bytes_accessed=int(c.size) * 4 + int(w_flat.size) * 2
                       + int(U_pad.size) * 2 + B * C * T_pad * 4,
    )

    out2d = pl.pallas_call(
        _fused_kernel,
        out_shape=jax.ShapeDtypeStruct((B * C, T_pad), c.dtype),
        grid=(n_tiles,),
        in_specs=[
            # Grid-invariant operands (constant index_map). For production sizes also
            # mark these pipeline_mode=pl.Buffered(1) so they are single-buffered.
            pl.BlockSpec((B, C, T), lambda t: (0, 0, 0)),
            pl.BlockSpec((C, K * C), lambda t: (0, 0)),
            # Per-output-time-tile column block of U.
            # TODO(synk): for production T, also restrict the rows to the banded slice
            # (~TT/prod(scales) + halo rows) each tile depends on.
            pl.BlockSpec((T_mid, TT), lambda t: (0, t)),
        ],
        out_specs=pl.BlockSpec((B * C, TT), lambda t: (0, t)),
        compiler_params=pltpu.CompilerParams(
            dimension_semantics=("parallel",),       # >=2 time tiles feed both v7x TCs
            vmem_limit_bytes=32 * 1024 * 1024,
        ),
        cost_estimate=cost,
    )(c, w_flat, U_pad)

    # (B*C, T_pad) -> (B, C, T_final); padded lanes of U are zero columns, sliced off.
    return out2d.reshape(B, C, T_pad)[..., :T_final]


# ----------------------------- pure-JAX reference -----------------------------

def reference_forward(c, params, upsample_scales):
    y = lax.conv_general_dilated(
        c, params["conv_in_w"], window_strides=(1,), padding="VALID",
        dimension_numbers=("NCH", "OIH", "NCH"))
    for i, s in enumerate(upsample_scales):
        B, C, T = y.shape
        yr = jnp.repeat(y, s, axis=-1).reshape(B * C, 1, T * s)
        w2 = params["up_w"][i].reshape(1, 1, 2 * s + 1)
        y2 = lax.conv_general_dilated(
            yr, w2, window_strides=(1,), padding=[(s, s)],
            dimension_numbers=("NCH", "OIH", "NCH"))
        y = y2.reshape(B, C, T * s)
    return y


if __name__ == "__main__":
    B, C, T = 2, 32, 16                 # batch, aux_channels, input frames
    aux_context_window = 2
    upsample_scales = [2, 3]
    K = 2 * aux_context_window + 1      # conv_in kernel size (non-causal)

    key = jax.random.PRNGKey(0)
    k_in, k_w, k_u0, k_u1 = jax.random.split(key, 4)

    c = jax.random.normal(k_in, (B, C, T), dtype=jnp.float32)
    params = {
        # torch Conv1d weight layout (C_out, C_in, K), normal(0, 0.02) like _init_weights
        "conv_in_w": 0.02 * jax.random.normal(k_w, (C, C, K), dtype=jnp.float32),
        # Conv2d(1,1,(1,2s+1)) weights, flattened time kernels
        "up_w": [
            1.0 / (2 * upsample_scales[0] + 1)
            + 0.02 * jax.random.normal(k_u0, (2 * upsample_scales[0] + 1,), jnp.float32),
            1.0 / (2 * upsample_scales[1] + 1)
            + 0.02 * jax.random.normal(k_u1, (2 * upsample_scales[1] + 1,), jnp.float32),
        ],
    }

    out = conv_in_upsample_forward(c, params, upsample_scales)
    out = jax.block_until_ready(out)

    T_expected = (T - 2 * aux_context_window) * int(np.prod(upsample_scales))
    assert out.shape == (B, C, T_expected), out.shape

    ref = jax.block_until_ready(reference_forward(c, params, upsample_scales))
    # bf16 MXU operands with f32 accumulation -> tolerance relaxed vs the f32 version.
    np.testing.assert_allclose(np.asarray(out), np.asarray(ref), rtol=2e-2, atol=1e-2)

    print("KERNEL_OK")
</pallas_src>

<mosaic_0001>
module attributes {stable_mosaic.version = 11 : i64} {
  func.func @_fused_kernel(%arg0: i32, %arg1: memref<2x32x16xf32, #tpu.memory_space<vmem>>, %arg2: memref<32x160xbf16, #tpu.memory_space<vmem>>, %arg3: memref<12x128xbf16, #tpu.memory_space<vmem>>, %arg4: memref<64x128xf32, #tpu.memory_space<vmem>>) attributes {dimension_semantics = [#tpu.dimension_semantics<parallel>], iteration_bounds = array<i64: 1>, scalar_prefetch = 0 : i64, scratch_operands = 0 : i64, tpu.core_type = #tpu.core_type<tc>, window_params = [{pipeline_mode = #tpu.pipeline_mode<synchronous>, transform_indices = @transform_0, window_bounds = array<i64: 2, 32, 16>}, {pipeline_mode = #tpu.pipeline_mode<synchronous>, transform_indices = @transform_1, window_bounds = array<i64: 32, 160>}, {transform_indices = @transform_2, window_bounds = array<i64: 12, 128>}, {transform_indices = @transform_3, window_bounds = array<i64: 64, 128>}]} {
    %c0 = arith.constant 0 : index
    %c0_0 = arith.constant 0 : index
    %c0_1 = arith.constant 0 : index
    %0 = vector.load %arg1[%c0, %c0_0, %c0_1] : memref<2x32x16xf32, #tpu.memory_space<vmem>>, vector<2x32x16xf32>
    %1 = vector.extract_strided_slice %0 {offsets = [0, 0, 0], sizes = [1, 32, 12], strides = [1, 1, 1]} : vector<2x32x16xf32> to vector<1x32x12xf32>
    %2 = vector.shape_cast %1 : vector<1x32x12xf32> to vector<32x12xf32>
    %3 = vector.extract_strided_slice %0 {offsets = [0, 0, 1], sizes = [1, 32, 12], strides = [1, 1, 1]} : vector<2x32x16xf32> to vector<1x32x12xf32>
    %4 = vector.shape_cast %3 : vector<1x32x12xf32> to vector<32x12xf32>
    %5 = vector.extract_strided_slice %0 {offsets = [0, 0, 2], sizes = [1, 32, 12], strides = [1, 1, 1]} : vector<2x32x16xf32> to vector<1x32x12xf32>
    %6 = vector.shape_cast %5 : vector<1x32x12xf32> to vector<32x12xf32>
    %7 = vector.extract_strided_slice %0 {offsets = [0, 0, 3], sizes = [1, 32, 12], strides = [1, 1, 1]} : vector<2x32x16xf32> to vector<1x32x12xf32>
    %8 = vector.shape_cast %7 : vector<1x32x12xf32> to vector<32x12xf32>
    %9 = vector.extract_strided_slice %0 {offsets = [0, 0, 4], sizes = [1, 32, 12], strides = [1, 1, 1]} : vector<2x32x16xf32> to vector<1x32x12xf32>
    %10 = vector.shape_cast %9 : vector<1x32x12xf32> to vector<32x12xf32>
    %11 = tpu.concatenate %2, %4, %6, %8, %10 in 0 : vector<32x12xf32>, vector<32x12xf32>, vector<32x12xf32>, vector<32x12xf32>, vector<32x12xf32> -> vector<160x12xf32>
    %c0_2 = arith.constant 0 : index
    %c0_3 = arith.constant 0 : index
    %12 = vector.load %arg2[%c0_2, %c0_3] : memref<32x160xbf16, #tpu.memory_space<vmem>>, vector<32x160xbf16>
    %13 = arith.truncf %11 : vector<160x12xf32> to vector<160x12xbf16>
    %cst = arith.constant dense<0.000000e+00> : vector<32x12xf32>
    %14 = tpu.matmul %12, %13, %cst {dimension_numbers = #tpu.dot_dimension_numbers<[1], [0], [0], [1], [0, 0, 1, 1], [], []>} : vector<32x160xbf16>, vector<160x12xbf16>, vector<32x12xf32> -> vector<32x12xf32>
    %15 = vector.extract_strided_slice %0 {offsets = [1, 0, 0], sizes = [1, 32, 12], strides = [1, 1, 1]} : vector<2x32x16xf32> to vector<1x32x12xf32>
    %16 = vector.shape_cast %15 : vector<1x32x12xf32> to vector<32x12xf32>
    %17 = vector.extract_strided_slice %0 {offsets = [1, 0, 1], sizes = [1, 32, 12], strides = [1, 1, 1]} : vector<2x32x16xf32> to vector<1x32x12xf32>
    %18 = vector.shape_cast %17 : vector<1x32x12xf32> to vector<32x12xf32>
    %19 = vector.extract_strided_slice %0 {offsets = [1, 0, 2], sizes = [1, 32, 12], strides = [1, 1, 1]} : vector<2x32x16xf32> to vector<1x32x12xf32>
    %20 = vector.shape_cast %19 : vector<1x32x12xf32> to vector<32x12xf32>
    %21 = vector.extract_strided_slice %0 {offsets = [1, 0, 3], sizes = [1, 32, 12], strides = [1, 1, 1]} : vector<2x32x16xf32> to vector<1x32x12xf32>
    %22 = vector.shape_cast %21 : vector<1x32x12xf32> to vector<32x12xf32>
    %23 = vector.extract_strided_slice %0 {offsets = [1, 0, 4], sizes = [1, 32, 12], strides = [1, 1, 1]} : vector<2x32x16xf32> to vector<1x32x12xf32>
    %24 = vector.shape_cast %23 : vector<1x32x12xf32> to vector<32x12xf32>
    %25 = tpu.concatenate %16, %18, %20, %22, %24 in 0 : vector<32x12xf32>, vector<32x12xf32>, vector<32x12xf32>, vector<32x12xf32>, vector<32x12xf32> -> vector<160x12xf32>
    %c0_4 = arith.constant 0 : index
    %c0_5 = arith.constant 0 : index
    %26 = vector.load %arg2[%c0_4, %c0_5] : memref<32x160xbf16, #tpu.memory_space<vmem>>, vector<32x160xbf16>
    %27 = arith.truncf %25 : vector<160x12xf32> to vector<160x12xbf16>
    %cst_6 = arith.constant dense<0.000000e+00> : vector<32x12xf32>
    %28 = tpu.matmul %26, %27, %cst_6 {dimension_numbers = #tpu.dot_dimension_numbers<[1], [0], [0], [1], [0, 0, 1, 1], [], []>} : vector<32x160xbf16>, vector<160x12xbf16>, vector<32x12xf32> -> vector<32x12xf32>
    %29 = tpu.concatenate %14, %28 in 0 : vector<32x12xf32>, vector<32x12xf32> -> vector<64x12xf32>
    %30 = arith.truncf %29 : vector<64x12xf32> to vector<64x12xbf16>
    %c0_7 = arith.constant 0 : index
    %c0_8 = arith.constant 0 : index
    %31 = vector.load %arg3[%c0_7, %c0_8] : memref<12x128xbf16, #tpu.memory_space<vmem>>, vector<12x128xbf16>
    %cst_9 = arith.constant dense<0.000000e+00> : vector<64x128xf32>
    %32 = tpu.matmul %30, %31, %cst_9 {dimension_numbers = #tpu.dot_dimension_numbers<[1], [0], [0], [1], [0, 0, 1, 1], [], []>} : vector<64x12xbf16>, vector<12x128xbf16>, vector<64x128xf32> -> vector<64x128xf32>
    %c0_10 = arith.constant 0 : index
    %c0_11 = arith.constant 0 : index
    %33 = vector.load %arg4[%c0_10, %c0_11] : memref<64x128xf32, #tpu.memory_space<vmem>>, vector<64x128xf32>
    tpu.vector_store %arg4[%c0_10, %c0_11], %32 {strides = array<i32>} : memref<64x128xf32, #tpu.memory_space<vmem>>, vector<64x128xf32>,
    return
  }
  func.func @transform_0(%arg0: i32) -> (i32, i32, i32) {
    %c0_i32 = arith.constant 0 : i32
    %c0_i32_0 = arith.constant 0 : i32
    %c0_i32_1 = arith.constant 0 : i32
    %c0_i32_2 = arith.constant 0 : i32
    return %c0_i32, %c0_i32_0, %c0_i32_1 : i32, i32, i32
  }
  func.func @transform_1(%arg0: i32) -> (i32, i32) {
    %c0_i32 = arith.constant 0 : i32
    %c0_i32_0 = arith.constant 0 : i32
    %c0_i32_1 = arith.constant 0 : i32
    return %c0_i32, %c0_i32_0 : i32, i32
  }
  func.func @transform_2(%arg0: i32) -> (i32, i32) {
    %c0_i32 = arith.constant 0 : i32
    %c0_i32_0 = arith.constant 0 : i32
    return %c0_i32, %arg0 : i32, i32
  }
  func.func @transform_3(%arg0: i32) -> (i32, i32) {
    %c0_i32 = arith.constant 0 : i32
    %c0_i32_0 = arith.constant 0 : i32
    return %c0_i32, %arg0 : i32, i32
  }
}

</mosaic_0001>

<bundles_post_ra>
// kernel: tpu_custom_call.1
= control target key start
LH: loop header
LB: loop body
LE: loop exit
PB: predicated region body
PF: predicated region fallthrough
CT: control target
= control target key end

     0   :  { %v541_v7 = vmov 0   ;;  %s542_s28 = smov 125   ;;  %s683_s0 = inlined_call_operand.vmem [shape: f32[2,32,16], index: 0, kind: input, shape index: {}]   ;;  %s684_s1 = inlined_call_operand.vmem [shape: bf16[32,160], index: 1, kind: input, shape index: {}]   ;;  %s685_s2 = inlined_call_operand.vmem [shape: bf16[12,128], index: 2, kind: input, shape index: {}]   ;;  %s686_s3 = inlined_call_operand.hbm [shape: f32[64,128], index: 3, kind: output, shape index: {}]  }
   0x1   :  { %v572_v0 = vld [vmem:[%s683_s0 + $0x10] sm:$0xff]  ;;  %v577_v1 = vld [vmem:[%s683_s0 + $0x18] sm:$0xff]  ;;  %v594_v5 = vld [vmem:[%s683_s0] sm:$0xff]  ;;  %115 = vmatprep.subr.bf16.mxu0 %v541_v7  ;;  %226 = vmatprep.subr.bf16.mxu1 %v541_v7 }
   0x2   :  { %v582_v2 = vld [vmem:[%s683_s0 + $0x30] sm:$0xff]  ;;  %v432_v3 = vpack.i.bf16 %v577_v1, %v572_v0  ;;  %v589_v4 = vld [vmem:[%s683_s0 + $0x38] sm:$0xff]  ;;  %v599_v6 = vld [vmem:[%s683_s0 + $0x8] sm:$0xff] }
   0x3   :  { %v442_v8 = vpack.i.bf16 %v599_v6, %v594_v5  ;;  %v607_v9 = vld [vmem:[%s683_s0 + $0x20] sm:$0xff]  ;;  %v612_v10 = vld [vmem:[%s683_s0 + $0x28] sm:$0xff]  ;;  %v437_v11 = vpack.i.bf16 %v589_v4, %v582_v2 }
   0x4   :  { %433 = vrot.lane.b32.xlu0 %v432_v3, %s542_s28  ;;  %v447_v12 = vpack.i.bf16 %v612_v10, %v607_v9 }
   0x5   :  { %443 = vrot.lane.b32.xlu1 %v442_v8, %s542_s28 }
   0x6   :  { %8 = vsyncpa [#allocation3], 0  ;;  %s543_s29 = smov 126   ;;  %v81_v13 = vpack.c.bf16 %v577_v1, %v572_v0  ;;  %s544_s0 = smov 127   ;;  %v80_v14 = vpack.c.bf16 %v599_v6, %v594_v5  ;;  %v217_v15 = vpack.c.bf16 %v589_v4, %v582_v2  ;;  %v216_v16 = vpack.c.bf16 %v612_v10, %v607_v9  ;;  %v514_v17 = vld [vmem:[%s684_s1 + $0x4] ss:$8 sps:$4 sm:$0xff]  }
   0x7   :  { %s545_s30 = smov 124   ;;  %vm108_vm0 = vcmask 261120   ;;  %v512_v2 = vld [vmem:[%s684_s1] ss:$8 sps:$4 sm:$0xff]   ;;  %v517_v9 = vld [vmem:[%s684_s1 + $0x10] ss:$8 sps:$4 sm:$0xff]  }
   0x8   :  { %438 = vrot.lane.b32.xlu0 %v437_v11, %s542_s28  ;;  %396 = vmatprep.mubr.msk.bf16.mxu0 %vm108_vm0, %v514_v17  ;;  %v518_v10 = vld [vmem:[%s685_s2] sm:$0x3f]   ;;  %vm299_vm1 = vcmask 1045504   ;;  %vm286_vm2 = vcmask 97280  }
   0x9   :  { %448 = vrot.lane.b32.xlu1 %v447_v12, %s542_s28  ;;  %398 = vmatprep.mubr.msk.bf16.mxu1 %vm108_vm0, %v514_v17 }
   0xc   :  { %453 = vrot.lane.b32.xlu0 %v432_v3, %s543_s29 }
   0xd   :  { %458 = vrot.lane.b32.xlu1 %v437_v11, %s543_s29 }
  0x10   :  { %463 = vrot.lane.b32.xlu0 %v442_v8, %s543_s29 }
  0x11   :  { %468 = vrot.lane.b32.xlu1 %v447_v12, %s543_s29 }
  0x14   :  { %473 = vrot.lane.b32.xlu0 %v432_v3, %s544_s0 }
  0x15   :  { %478 = vrot.lane.b32.xlu1 %v437_v11, %s544_s0 }
  0x18   :  { %483 = vrot.lane.b32.xlu0 %v442_v8, %s544_s0 }
  0x19   :  { %488 = vrot.lane.b32.xlu1 %v447_v12, %s544_s0 }
  0x1c   :  { %493 = vrot.lane.b32.xlu0 %v432_v3, %s545_s30 }
  0x1d   :  { %498 = vrot.lane.b32.xlu1 %v437_v11, %s545_s30 }
  0x20   :  { %503 = vrot.lane.b32.xlu0 %v442_v8, %s545_s30 }
  0x21   :  { %508 = vrot.lane.b32.xlu1 %v447_v12, %s545_s30 }
  0x76   :  { %v434_v18 = vpop.permute.xlu0 %433 }
  0x77   :  { %v436_v19 = vunpack.i.h.bf16 %v434_v18  ;;  %v435_v20 = vunpack.i.l.bf16 %v434_v18  ;;  %v444_v21 = vpop.permute.xlu1 %443 }
  0x78   :  { %v446_v22 = vunpack.i.h.bf16 %v444_v21  ;;  %v445_v23 = vunpack.i.l.bf16 %v444_v21 }
  0x79   :  { %v87_v24 = vpack.c.bf16 %v436_v19, %v435_v20 }
  0x7a   :  { %v439_v25 = vpop.permute.xlu0 %438  ;;  %v86_v28 = vpack.c.bf16 %v446_v22, %v445_v23 }
  0x7b   :  { %v441_v26 = vunpack.i.h.bf16 %v439_v25  ;;  %v440_v27 = vunpack.i.l.bf16 %v439_v25  ;;  %116 = vmatpush1.bf16.msra.mxu0 %v87_v24  ;;  %v449_v29 = vpop.permute.xlu1 %448 }
  0x7c   :  { %117 = vmatprep.subr.bf16.mxu0 %v541_v7  ;;  %v451_v30 = vunpack.i.h.bf16 %v449_v29  ;;  %v450_v31 = vunpack.i.l.bf16 %v449_v29 }
  0x7d   :  { %v223_v32 = vpack.c.bf16 %v441_v26, %v440_v27 }
  0x7e   :  { %v454_v33 = vpop.permute.xlu0 %453  ;;  %v222_v36 = vpack.c.bf16 %v451_v30, %v450_v31 }
  0x7f   :  { %v456_v34 = vunpack.i.h.bf16 %v454_v33  ;;  %v455_v35 = vunpack.i.l.bf16 %v454_v33  ;;  %118 = vmatpush1.bf16.msra.mxu0 %v86_v28  ;;  %227 = vmatpush1.bf16.msra.mxu1 %v223_v32  ;;  %v459_v37 = vpop.permute.xlu1 %458 }
  0x80   :  { %228 = vmatprep.subr.bf16.mxu1 %v541_v7  ;;  %v461_v38 = vunpack.i.h.bf16 %v459_v37  ;;  %v460_v39 = vunpack.i.l.bf16 %v459_v37  ;;  %119 = vmatprep.subr.bf16.mxu0 %v541_v7 }
  0x81   :  { %v85_v40 = vpack.c.bf16 %v456_v34, %v455_v35 }
  0x82   :  { %v464_v41 = vpop.permute.xlu0 %463  ;;  %v221_v44 = vpack.c.bf16 %v461_v38, %v460_v39 }
  0x83   :  { %v466_v42 = vunpack.i.h.bf16 %v464_v41  ;;  %v465_v43 = vunpack.i.l.bf16 %v464_v41  ;;  %120 = vmatpush1.bf16.msra.mxu0 %v85_v40  ;;  %229 = vmatpush1.bf16.msra.mxu1 %v222_v36  ;;  %v469_v45 = vpop.permute.xlu1 %468 }
  0x84   :  { %v471_v46 = vunpack.i.h.bf16 %v469_v45  ;;  %v470_v47 = vunpack.i.l.bf16 %v469_v45  ;;  %121 = vmatprep.subr.bf16.mxu0 %v541_v7  ;;  %230 = vmatprep.subr.bf16.mxu1 %v541_v7 }
  0x85   :  { %v84_v48 = vpack.c.bf16 %v466_v42, %v465_v43 }
  0x86   :  { %v474_v49 = vpop.permute.xlu0 %473  ;;  %v220_v52 = vpack.c.bf16 %v471_v46, %v470_v47 }
  0x87   :  { %v476_v50 = vunpack.i.h.bf16 %v474_v49  ;;  %v475_v51 = vunpack.i.l.bf16 %v474_v49  ;;  %122 = vmatpush1.bf16.msra.mxu0 %v84_v48  ;;  %231 = vmatpush1.bf16.msra.mxu1 %v221_v44  ;;  %v479_v53 = vpop.permute.xlu1 %478 }
  0x88   :  { %v481_v54 = vunpack.i.h.bf16 %v479_v53  ;;  %v480_v55 = vunpack.i.l.bf16 %v479_v53  ;;  %123 = vmatprep.subr.bf16.mxu0 %v541_v7  ;;  %232 = vmatprep.subr.bf16.mxu1 %v541_v7 }
  0x89   :  { %v83_v56 = vpack.c.bf16 %v476_v50, %v475_v51 }
  0x8a   :  { %v484_v57 = vpop.permute.xlu0 %483  ;;  %v219_v60 = vpack.c.bf16 %v481_v54, %v480_v55 }
  0x8b   :  { %v486_v58 = vunpack.i.h.bf16 %v484_v57  ;;  %v485_v59 = vunpack.i.l.bf16 %v484_v57  ;;  %124 = vmatpush1.bf16.msra.mxu0 %v83_v56  ;;  %233 = vmatpush1.bf16.msra.mxu1 %v220_v52  ;;  %v489_v61 = vpop.permute.xlu1 %488 }
  0x8c   :  { %v491_v62 = vunpack.i.h.bf16 %v489_v61  ;;  %v490_v63 = vunpack.i.l.bf16 %v489_v61  ;;  %125 = vmatprep.subr.bf16.mxu0 %v541_v7  ;;  %234 = vmatprep.subr.bf16.mxu1 %v541_v7 }
  0x8d   :  { %v82_v3 = vpack.c.bf16 %v486_v58, %v485_v59 }
  0x8e   :  { %v494_v8 = vpop.permute.xlu0 %493  ;;  %v218_v11 = vpack.c.bf16 %v491_v62, %v490_v63 }
  0x8f   :  { %126 = vmatpush1.bf16.msra.mxu0 %v82_v3  ;;  %235 = vmatpush1.bf16.msra.mxu1 %v219_v60  ;;  %v499_v12 = vpop.permute.xlu1 %498  ;;  %v496_v17 = vunpack.i.h.bf16 %v494_v8  ;;  %v495_v18 = vunpack.i.l.bf16 %v494_v8 }
  0x90   :  { %127 = vmatprep.subr.bf16.mxu0 %v541_v7  ;;  %236 = vmatprep.subr.bf16.mxu1 %v541_v7  ;;  %v501_v20 = vunpack.i.h.bf16 %v499_v12 }
  0x91   :  { %v89_v21 = vpack.c.bf16 %v496_v17, %v495_v18 }
  0x92   :  { %v504_v19 = vpop.permute.xlu0 %503 }
  0x93   :  { %128 = vmatpush1.bf16.msra.mxu0 %v81_v13  ;;  %237 = vmatpush1.bf16.msra.mxu1 %v218_v11  ;;  %v506_v0 = vunpack.i.h.bf16 %v504_v19  ;;  %v505_v1 = vunpack.i.l.bf16 %v504_v19  ;;  %v500_v13 = vunpack.i.l.bf16 %v499_v12  ;;  %v509_v22 = vpop.permute.xlu1 %508 }
  0x94   :  { %129 = vmatprep.subr.bf16.mxu0 %v541_v7  ;;  %238 = vmatprep.subr.bf16.mxu1 %v541_v7  ;;  %v511_v5 = vunpack.i.h.bf16 %v509_v22  ;;  %v510_v6 = vunpack.i.l.bf16 %v509_v22 }
  0x95   :  { %v88_v23 = vpack.c.bf16 %v506_v0, %v505_v1  ;;  %v225_v24 = vpack.c.bf16 %v501_v20, %v500_v13 }
  0x96   :  { %v224_v4 = vpack.c.bf16 %v511_v5, %v510_v6 }
  0x97   :  { %130 = vmatpush1.bf16.msra.mxu0 %v80_v14  ;;  %239 = vmatpush1.bf16.msra.mxu1 %v217_v15  ;;  %v515_v14 = vld [vmem:[%s684_s1 + $0x14] ss:$8 sps:$4 sm:$0xff]   ;;  %s546_s1 = smov [#allocation2]  }
  0x98   :  { %143 = vmatprep.subr.bf16.mxu0 %v541_v7  ;;  %240 = vmatprep.subr.bf16.mxu1 %v541_v7  ;;  %s381_s2 = sshll.u32 %s546_s1, 4  ;;  %s382_s2 = int_to_ptr.vmem [resolvable:$true] %s381_s2 }
  0x99   :  { %s519_s14 = scalar_lea.vmem %s382_s2, 1024  ;;  %p524_p1 = scmp.lt.s32.totalorder %s382_s2, %s382_s2 }
  0x9a   :  { %p520_p0 = scmp.ne.s32.totalorder %s382_s2, %s519_s14  ;;  %p525_p2 = scmp.lt.s32.totalorder %s519_s14, %s519_s14 }
  0x9b   :  { %144 = vmatpush2.bf16.msra.mxu0 %v89_v21  ;;  %241 = vmatpush1.bf16.msra.mxu1 %v216_v16 }
  0x9c   :  { %145 = vmatprep.subr.bf16.mxu0 %v541_v7  ;;  %254 = vmatprep.subr.bf16.mxu1 %v541_v7  ;;  %p526_p3 = por %p525_p2, %p524_p1 }
  0x9e   :  { %p527_p4 = pnand %p526_p3, %p520_p0 }
  0x9f   :  { %146 = vmatpush2.bf16.msra.mxu0 %v88_v23  ;;  %255 = vmatpush2.bf16.msra.mxu1 %v225_v24 }
  0xa0   :  { %256 = vmatprep.subr.bf16.mxu1 %v541_v7  ;;  %422 = vmatprep.subr.msk.bf16.mxu0 %vm299_vm1, %v518_v10  ;;  %v301_v7 = vsel %vm299_vm1, %v518_v10, 0 }
  0xa2   :  { %148 = vmatmul.mubr.bf16.vlgmr.msra.gmra.mxu0 %v512_v2 }
  0xa3   :  { %257 = vmatpush2.bf16.msra.mxu1 %v224_v4  ;;  %397 = vmatprep.mubr.msk.bf16.mxu0 %vm108_vm0, %v515_v14 }
  0xa4   :  { %423 = vmatprep.subr.msk.bf16.mxu1 %vm299_vm1, %v518_v10  ;;  %411 = vmatpush3.bf16.msra.mxu0 %v301_v7 }
  0xa6   :  { %259 = vmatmul.mubr.bf16.vlgmr.msra.gmra.mxu1 %v512_v2 }
  0xa7   :  { %399 = vmatprep.mubr.msk.bf16.mxu1 %vm108_vm0, %v515_v14  ;;  %421 = vmatpush3.bf16.msra.mxu1 %v301_v7 }
  0xaa   :  { %156 = vmatmul.mubr.bf16.gmra.mxu0 %v517_v9 }
  0xae   :  { %267 = vmatmul.mubr.bf16.gmra.mxu1 %v517_v9 }
 0x162   :  { %v149_v15 = vpop.f32.mrf.mxu0 }
 0x164   :  { %v151_v16 = vpop.f32.mrf.mxu0 }
 0x166   :  { %v152_v25 = vpop.f32.mrf.mxu0  ;;  %v260_v26 = vpop.f32.mrf.mxu1 }
 0x167   :  { %v275_v27 = vpack.c.bf16 %v152_v25, %v149_v15 }
 0x168   :  { %v154_v28 = vpop.f32.mrf.mxu0  ;;  %v262_v29 = vpop.f32.mrf.mxu1 }
 0x169   :  { %412 = vmatprep.mubr.msk.bf16.mxu0 %vm286_vm2, %v275_v27 }
 0x16a   :  { %v157_v30 = vpop.f32.mrf.mxu0  ;;  %v263_v31 = vpop.f32.mrf.mxu1 }
 0x16b   :  { %v277_v32 = vpack.c.bf16 %v263_v31, %v260_v26 }
 0x16c   :  { %v159_v33 = vpop.f32.mrf.mxu0  ;;  %v265_v34 = vpop.f32.mrf.mxu1 }
 0x16d   :  { %416 = vmatprep.mubr.msk.bf16.mxu1 %vm286_vm2, %v277_v32 }
 0x16e   :  { %v160_v35 = vpop.f32.mrf.mxu0  ;;  %v268_v36 = vpop.f32.mrf.mxu1 }
 0x16f   :  { %v276_v37 = vpack.c.bf16 %v160_v35, %v157_v30 }
 0x170   :  { %v162_v38 = vpop.f32.mrf.mxu0  ;;  %v270_v39 = vpop.f32.mrf.mxu1 }
 0x171   :  { %413 = vmatmul.mubr.msk.bf16.vlgmr.msra.gmra.mxu0 %vm286_vm2, %v276_v37 }
 0x172   :  { %v271_v40 = vpop.f32.mrf.mxu1 }
 0x173   :  { %v278_v41 = vpack.c.bf16 %v271_v40, %v268_v36 }
 0x174   :  { %v273_v42 = vpop.f32.mrf.mxu1 }
 0x175   :  { %417 = vmatmul.mubr.msk.bf16.vlgmr.msra.gmra.mxu1 %vm286_vm2, %v278_v41 }
 0x231   :  { %v414_v43 = vpop.f32.mrf.mxu0 }
 0x232   :  { %370 = vst [vmem:[#allocation2 + $0x10] sm:$0xff] %v414_v43 }
 0x233   :  { %v337_v44 = vpop.f32.mrf.mxu0 }
 0x234   :  { %368 = vst [vmem:[#allocation2] sm:$0xff] %v337_v44 }
 0x235   :  { %v415_v45 = vpop.f32.mrf.mxu0  ;;  %v418_v46 = vpop.f32.mrf.mxu1 }
 0x236   :  { %371 = vst [vmem:[#allocation2 + $0x18] sm:$0xff] %v415_v45  ;;  %374 = vst [vmem:[#allocation2 + $0x30] sm:$0xff] %v418_v46 }
 0x237   :  { %v340_v47 = vpop.f32.mrf.mxu0  ;;  %v353_v48 = vpop.f32.mrf.mxu1 }
 0x238   :  { %369 = vst [vmem:[#allocation2 + $0x8] sm:$0xff] %v340_v47  ;;  %372 = vst [vmem:[#allocation2 + $0x20] sm:$0xff] %v353_v48 }
 0x239   :  { %v419_v49 = vpop.f32.mrf.mxu1 }
 0x23a   :  { %375 = vst [vmem:[#allocation2 + $0x38] sm:$0xff] %v419_v49 }
 0x23b   :  { %v356_v50 = vpop.f32.mrf.mxu1 }
 0x23c   :  { %373 = vst [vmem:[#allocation2 + $0x28] sm:$0xff] %v356_v50 }
 0x23d   :  { %530 = shalt.err (!%p527_p4)
}
 0x23e   :  { %s547_s15 = smov 128   ;;  %s548_s16 = smov 8  }
 0x23f   :  { %387 = dma.vmem_to_hbm [thread:$0]  %s382_s2, 1024, %s686_s3, [#allocation3], %s547_s15, %s547_s15, %s548_s16  }
 0x240   :  { %539 = dma.done.wait [#allocation3], 1024  }
 0x241   :  { %540 = vsyncadd [#allocation3], 4294966272 }
 0x242   :  { %391 = vsyncpa [#allocation3], 1 }

</bundles_post_ra>
